<compile_context>
chip_gen: v7x
topology: tpu7x:2x2x1
jax: 0.10.0
libtpu: 0.0.40
codegen_flags: <defaults>
</compile_context>

<pallas_src>
import functools

import jax
import jax.numpy as jnp
from jax.experimental import pallas as pl
from jax.experimental.pallas import tpu as pltpu

_NUM_CORES = 2  # v7x has 2 TensorCores/chip; extra parallel axis is harmless elsewhere.


def _nce_kernel(pred_ref, labels_ref, out_ref, acc_ref, *,
                n_rows, n_classes, tile_n, blocks_per_core):
    j = pl.program_id(1)  # reduction step within this core's slice of the batch

    @pl.when(j == 0)
    def _init():
        acc_ref[0, 0] = jnp.float32(0.0)

    # Global block index for this step (the DMA index_map clamps to the last
    # valid block; any rows past the true batch size are masked out here).
    gblk = pl.program_id(0) * blocks_per_core + j
    row = gblk * tile_n + jax.lax.broadcasted_iota(jnp.int32, (tile_n, 1), 0)
    valid = row < n_rows                                         # (T, 1) bool

    x = pred_ref[...].astype(jnp.float32)                        # (T, C)
    x = jnp.where(valid, x, 0.0)                                 # neutralize padded rows
    lab = labels_ref[...]                                        # (T, 1) int32

    # log-softmax reductions without forming logp / onehot:
    m = jnp.max(x, axis=1, keepdims=True)                        # (T, 1)
    sum_exp = jnp.sum(jnp.exp(x - m), axis=1, keepdims=True)     # (T, 1)
    lse = m + jnp.log(sum_exp)                                   # logsumexp(x)

    lane = jax.lax.broadcasted_iota(jnp.int32, x.shape, 1)       # (T, C)
    x_label = jnp.sum(jnp.where(lane == lab, x, 0.0), axis=1, keepdims=True)
    sum_x = jnp.sum(x, axis=1, keepdims=True)

    num = lse - x_label                           # -logp[label]
    den = jnp.float32(n_classes) * lse - sum_x    # -sum(logp)  (> 0 always)
    nce = num * pl.reciprocal(den, approx=False)                 # (T, 1)

    acc_ref[0, 0] += jnp.sum(jnp.where(valid, nce, 0.0))

    @pl.when(j == pl.num_programs(1) - 1)
    def _finalize():
        # one lane-dense (1,128) store per core
        out_ref[...] = jnp.full((1, 128), acc_ref[0, 0], dtype=jnp.float32)


def _choose_tile_n(n, c, itemsize):
    """Largest row tile whose double-buffered logits fit comfortably in VMEM."""
    per_buffer_budget = 4 * 1024 * 1024   # 2 buffers -> 8 MiB; safe on v7x (64 MiB VMEM/TC)
    rows = per_buffer_budget // max(1, c * itemsize)
    rows = max(8, (rows // 8) * 8)
    rows = min(rows, 1024)
    if n <= 8:
        return n                          # full-dim block (exempt from the 8-row rule)
    return min(rows, (n // 8) * 8)        # keep block <= array extent


@functools.partial(jax.jit, static_argnames=("num_classes", "scale"))
def normalized_cross_entropy(pred, labels, num_classes, scale=1.0):
    """pred: [N, C] float logits; labels: [N] int. Returns scalar float32."""
    n, c = pred.shape
    assert c == num_classes
    labels2d = labels.astype(jnp.int32).reshape(n, 1)

    itemsize = jnp.dtype(pred.dtype).itemsize
    tile_n = _choose_tile_n(n, c, itemsize)
    nblocks = pl.cdiv(n, tile_n)
    bpc = pl.cdiv(nblocks, _NUM_CORES)    # row blocks per core
    last_blk = nblocks - 1

    def in_map(i, j):
        # Clamp the second core's overhang steps onto a valid block; those
        # rows are masked out inside the kernel.
        return (jnp.minimum(i * bpc + j, last_blk), 0)

    kernel = functools.partial(
        _nce_kernel, n_rows=n, n_classes=c, tile_n=tile_n, blocks_per_core=bpc)

    out = pl.pallas_call(
        kernel,
        out_shape=jax.ShapeDtypeStruct((1, _NUM_CORES * 128), jnp.float32),
        grid=(_NUM_CORES, bpc),
        in_specs=[
            pl.BlockSpec((tile_n, c), in_map),   # streamed logits tiles
            pl.BlockSpec((tile_n, 1), in_map),   # int32 labels, iota-compare (no gather)
        ],
        out_specs=pl.BlockSpec((1, 128), lambda i, j: (0, i)),
        scratch_shapes=[pltpu.SMEM((1, 1), jnp.float32)],
        compiler_params=pltpu.CompilerParams(
            dimension_semantics=("parallel", "arbitrary"),
            vmem_limit_bytes=32 * 1024 * 1024,
        ),
        cost_estimate=pl.CostEstimate(
            flops=8 * n * c,
            transcendentals=n * c,
            bytes_accessed=n * c * itemsize + n * 4 + _NUM_CORES * 128 * 4,
        ),
    )(pred, labels2d)

    partials = out.reshape(_NUM_CORES, 128)[:, 0]
    return (jnp.float32(scale) / jnp.float32(n)) * jnp.sum(partials)


def _reference(pred, labels, num_classes, scale):
    logp = jax.nn.log_softmax(pred, axis=1)
    onehot = jax.nn.one_hot(labels, num_classes, dtype=jnp.float32)
    nce = -jnp.sum(onehot * logp, axis=1) / (-jnp.sum(logp, axis=1))
    return scale * jnp.mean(nce)


if __name__ == "__main__":
    key = jax.random.PRNGKey(0)
    scale = 1.0

    # (batch, num_classes): one exact-tile case and one N % TILE_N remainder case.
    for n, c in [(8, 16), (37, 16)]:
        key, k1, k2 = jax.random.split(key, 3)
        pred = jax.random.normal(k1, (n, c), dtype=jnp.float32)
        labels = jax.random.randint(k2, (n,), 0, c, dtype=jnp.int32)

        loss = normalized_cross_entropy(pred, labels, num_classes=c, scale=scale)
        loss = jax.block_until_ready(loss)

        ref = _reference(pred, labels, c, scale)
        assert jnp.allclose(loss, ref, atol=1e-5, rtol=1e-5), (n, c, loss, ref)

    print("KERNEL_OK")
</pallas_src>

<mosaic_0001>
module attributes {stable_mosaic.version = 11 : i64} {
  func.func @_nce_kernel(%arg0: i32, %arg1: i32, %arg2: memref<8x16xf32, #tpu.memory_space<vmem>>, %arg3: memref<8x1xi32, #tpu.memory_space<vmem>>, %arg4: memref<1x128xf32, #tpu.memory_space<vmem>>, %arg5: memref<1x1xf32, #tpu.memory_space<smem>>) attributes {dimension_semantics = [#tpu.dimension_semantics<parallel>, #tpu.dimension_semantics<arbitrary>], iteration_bounds = array<i64: 2, 1>, scalar_prefetch = 0 : i64, scratch_operands = 1 : i64, tpu.core_type = #tpu.core_type<tc>, window_params = [{transform_indices = @transform_0, window_bounds = array<i64: 8, 16>}, {transform_indices = @transform_1, window_bounds = array<i64: 8, 1>}, {transform_indices = @transform_2, window_bounds = array<i64: 1, 128>}]} {
    %c0_i32 = arith.constant 0 : i32
    %0 = arith.cmpi eq, %arg1, %c0_i32 : i32
    %1 = arith.extui %0 : i1 to i32
    %c0_i32_0 = arith.constant 0 : i32
    %2 = arith.cmpi ne, %1, %c0_i32_0 : i32
    scf.if %2 {
      %cst_19 = arith.constant 0.000000e+00 : f32
      %c0_20 = arith.constant 0 : index
      %c0_21 = arith.constant 0 : index
      %53 = memref.load %arg5[%c0_20, %c0_21] : memref<1x1xf32, #tpu.memory_space<smem>>
      memref.store %cst_19, %arg5[%c0_20, %c0_21] : memref<1x1xf32, #tpu.memory_space<smem>>
    } else {
    }
    %c1_i32 = arith.constant 1 : i32
    %3 = arith.muli %arg0, %c1_i32 : i32
    %4 = arith.addi %3, %arg1 : i32
    %c8_i32 = arith.constant 8 : i32
    %5 = arith.muli %4, %c8_i32 : i32
    %6 = tpu.iota {dimensions = array<i32: 0>} : vector<8x1xi32>
    %7 = vector.broadcast %5 : i32 to vector<8x1xi32>
    %8 = arith.addi %7, %6 : vector<8x1xi32>
    %c8_i32_1 = arith.constant 8 : i32
    %9 = vector.broadcast %c8_i32_1 : i32 to vector<8x1xi32>
    %10 = arith.cmpi slt, %8, %9 : vector<8x1xi32>
    %c0 = arith.constant 0 : index
    %c0_2 = arith.constant 0 : index
    %11 = vector.load %arg2[%c0, %c0_2] : memref<8x16xf32, #tpu.memory_space<vmem>>, vector<8x16xf32>
    %cst = arith.constant 0.000000e+00 : f32
    %12 = vector.shape_cast %10 : vector<8x1xi1> to vector<8x1xi1>
    %13 = vector.broadcast %12 : vector<8x1xi1> to vector<8x16xi1>
    %14 = vector.broadcast %cst : f32 to vector<8x16xf32>
    %15 = arith.select %13, %11, %14 : vector<8x16xi1>, vector<8x16xf32>
    %c0_3 = arith.constant 0 : index
    %c0_4 = arith.constant 0 : index
    %16 = vector.load %arg3[%c0_3, %c0_4] : memref<8x1xi32, #tpu.memory_space<vmem>>, vector<8x1xi32>
    %cst_5 = arith.constant dense<0xFF800000> : vector<8xf32>
    %17 = vector.multi_reduction <maximumf>, %15, %cst_5 [1] : vector<8x16xf32> to vector<8xf32>
    %18 = vector.shape_cast %17 : vector<8xf32> to vector<8x1xf32>
    %19 = vector.broadcast %18 : vector<8x1xf32> to vector<8x16xf32>
    %20 = arith.subf %15, %19 : vector<8x16xf32>
    %21 = math.exp %20 : vector<8x16xf32>
    %cst_6 = arith.constant dense<0.000000e+00> : vector<8xf32>
    %22 = vector.multi_reduction <add>, %21, %cst_6 [1] : vector<8x16xf32> to vector<8xf32>
    %23 = vector.shape_cast %22 : vector<8xf32> to vector<8x1xf32>
    %24 = math.log %23 : vector<8x1xf32>
    %25 = arith.addf %18, %24 : vector<8x1xf32>
    %26 = tpu.iota {dimensions = array<i32: 1>} : vector<8x16xi32>
    %27 = vector.broadcast %16 : vector<8x1xi32> to vector<8x16xi32>
    %28 = arith.cmpi eq, %26, %27 : vector<8x16xi32>
    %cst_7 = arith.constant 0.000000e+00 : f32
    %29 = vector.broadcast %cst_7 : f32 to vector<8x16xf32>
    %30 = arith.select %28, %15, %29 : vector<8x16xi1>, vector<8x16xf32>
    %cst_8 = arith.constant dense<0.000000e+00> : vector<8xf32>
    %31 = vector.multi_reduction <add>, %30, %cst_8 [1] : vector<8x16xf32> to vector<8xf32>
    %32 = vector.shape_cast %31 : vector<8xf32> to vector<8x1xf32>
    %cst_9 = arith.constant dense<0.000000e+00> : vector<8xf32>
    %33 = vector.multi_reduction <add>, %15, %cst_9 [1] : vector<8x16xf32> to vector<8xf32>
    %34 = vector.shape_cast %33 : vector<8xf32> to vector<8x1xf32>
    %35 = arith.subf %25, %32 : vector<8x1xf32>
    %cst_10 = arith.constant 1.600000e+01 : f32
    %36 = vector.broadcast %cst_10 : f32 to vector<8x1xf32>
    %37 = arith.mulf %36, %25 : vector<8x1xf32>
    %38 = arith.subf %37, %34 : vector<8x1xf32>
    %39 = tpu.reciprocal %38 : vector<8x1xf32> -> vector<8x1xf32>
    %40 = arith.mulf %35, %39 : vector<8x1xf32>
    %c0_11 = arith.constant 0 : index
    %c0_12 = arith.constant 0 : index
    %41 = memref.load %arg5[%c0_11, %c0_12] : memref<1x1xf32, #tpu.memory_space<smem>>
    %cst_13 = arith.constant 0.000000e+00 : f32
    %42 = vector.broadcast %cst_13 : f32 to vector<8x1xf32>
    %43 = arith.select %10, %40, %42 : vector<8x1xi1>, vector<8x1xf32>
    %44 = vector.shape_cast %43 : vector<8x1xf32> to vector<1x8x1xf32>
    %cst_14 = arith.constant dense<0.000000e+00> : vector<1xf32>
    %45 = vector.multi_reduction <add>, %44, %cst_14 [1, 2] : vector<1x8x1xf32> to vector<1xf32>
    %46 = vector.shape_cast %45 : vector<1xf32> to vector<1x1x1xf32>
    %47 = vector.extract %46[0, 0, 0] : f32 from vector<1x1x1xf32>
    %48 = arith.addf %41, %47 : f32
    %c0_15 = arith.constant 0 : index
    %c0_16 = arith.constant 0 : index
    %49 = memref.load %arg5[%c0_15, %c0_16] : memref<1x1xf32, #tpu.memory_space<smem>>
    memref.store %48, %arg5[%c0_15, %c0_16] : memref<1x1xf32, #tpu.memory_space<smem>>
    %c0_i32_17 = arith.constant 0 : i32
    %50 = arith.cmpi eq, %arg1, %c0_i32_17 : i32
    %51 = arith.extui %50 : i1 to i32
    %c0_i32_18 = arith.constant 0 : i32
    %52 = arith.cmpi ne, %51, %c0_i32_18 : i32
    scf.if %52 {
      %c0_19 = arith.constant 0 : index
      %c0_20 = arith.constant 0 : index
      %53 = memref.load %arg5[%c0_19, %c0_20] : memref<1x1xf32, #tpu.memory_space<smem>>
      %54 = vector.broadcast %53 : f32 to vector<1x128xf32>
      %c0_21 = arith.constant 0 : index
      %c0_22 = arith.constant 0 : index
      %55 = vector.load %arg4[%c0_21, %c0_22] : memref<1x128xf32, #tpu.memory_space<vmem>>, vector<1x128xf32>
      tpu.vector_store %arg4[%c0_21, %c0_22], %54 {strides = array<i32>} : memref<1x128xf32, #tpu.memory_space<vmem>>, vector<1x128xf32>,
    } else {
    }
    return
  }
  func.func @transform_0(%arg0: i32, %arg1: i32) -> (i32, i32) {
    %c1_i32 = arith.constant 1 : i32
    %0 = arith.muli %arg0, %c1_i32 : i32
    %1 = arith.addi %0, %arg1 : i32
    %c0_i32 = arith.constant 0 : i32
    %2 = arith.minsi %1, %c0_i32 : i32
    %c0_i32_0 = arith.constant 0 : i32
    %c0_i32_1 = arith.constant 0 : i32
    return %2, %c0_i32_0 : i32, i32
  }
  func.func @transform_1(%arg0: i32, %arg1: i32) -> (i32, i32) {
    %c1_i32 = arith.constant 1 : i32
    %0 = arith.muli %arg0, %c1_i32 : i32
    %1 = arith.addi %0, %arg1 : i32
    %c0_i32 = arith.constant 0 : i32
    %2 = arith.minsi %1, %c0_i32 : i32
    %c0_i32_0 = arith.constant 0 : i32
    %c0_i32_1 = arith.constant 0 : i32
    return %2, %c0_i32_0 : i32, i32
  }
  func.func @transform_2(%arg0: i32, %arg1: i32) -> (i32, i32) {
    %c0_i32 = arith.constant 0 : i32
    %c0_i32_0 = arith.constant 0 : i32
    return %c0_i32, %arg0 : i32, i32
  }
}

</mosaic_0001>

<bundles_post_ra>
// kernel: normalized_cross_entropy.1
= control target key start
LH: loop header
LB: loop body
LE: loop exit
PB: predicated region body
PF: predicated region fallthrough
CT: control target
= control target key end

     0   :  { %s436_s9 = smov 0   ;;  %s438_s10 = smov 0   ;;  %s485_s0 = inlined_call_operand.vmem [shape: f32[8,16], index: 0, kind: input, shape index: {}]   ;;  %s486_s1 = inlined_call_operand.vmem [shape: s32[8,1], index: 1, kind: input, shape index: {}]   ;;  %s487_s2 = inlined_call_operand.vmem [shape: f32[1,256], index: 2, kind: output, shape index: {}]  }
   0x1   :  { %s440_s11 = smov 0  }
   0x2 LB: > { %s24_s12 = sadd.s32 1, %s414_s10  ;;  %p350_p0 = scmp.ge.s32.totalorder %s418_s11, 1  ;;  %s418_s11 = sphi %s440_s11, %s12_s11   ;;  %s414_s10 = sphi %s438_s10, %s489_s10   ;;  %s410_s9 = sphi %s436_s9, %s488_s9  }
   0x3   : > { %p26_p1 = scmp.ge.s32.totalorder %s24_s12, 2  ;;  %p156_p2 = scmp.lt.s32.totalorder %s418_s11, 3 }
   0x5   : > { %s491_s12 = smov (%p26_p1, %s24_s12), 0  ;;  %p157_p3 = pnand %p350_p0, %p156_p2 }
   0x6   : > { %p186_p4 = scmp.lt.s32.totalorder (!%p157_p3), %s410_s9, 0  ;;  %s359_s13 = sshll.u32 (!%p157_p3), %s410_s9, 3  ;;  %v216_v0 = vlaneseq (!%p157_p3)  ;;  %v420_v2 = vmov (!%p157_p3), 0   ;;  %vm226_vm1 = vcmask (!%p157_p3), 130048   ;;  %vm259_vm3 = vcmask (!%p157_p3), 7168  }
   0x7   : > { %160 = sbr.rel (%p157_p3) target bundleno = 562 (0x232), region = 28  ;;  %v218_v1 = vstv (!%p157_p3), %s359_s13  ;;  %389 = vset.pattern.permute.xlu0 (!%p157_p3), %v420_v2  ;;  %p205_p5 = scmp.lt.s32.totalorder (!%p157_p3), %s410_s9, 1 }
   0x8   : > { %v217_v3 = vshrl.u32 (!%p157_p3), %v216_v0, 7  ;;  %v240_v12 = vand.u32 (!%p157_p3), 127, %v216_v0 }
   0xa   : > { %v219_v4 = vadd.s32 (!%p157_p3), %v218_v1, %v217_v3 }
   0xc   : > { %vm220_vm0 = vcmp.lt.s32.totalorder (!%p157_p3), %v219_v4, 8 }
   0xe   : > { %s187_s14 = scalar_select %p186_p4, %s410_s9, 0 }
   0xf   : > { %s495_s9 = smov (!%p205_p5, %s410_s9), 1 }
  0x10   : > { %s493_s14 = smov (!%p186_p4, %s187_s14), 0  ;;  %s207_s24 = scalar_lea.vmem %s487_s2, %s495_s9 }
  0x11   : > { %s354_s15 = sshll.u32 %s493_s14, 3 }
  0x12   : > { %s191_s18 = scalar_lea.vmem %s485_s0, %s354_s15  ;;  %s201_s21 = scalar_lea.vmem %s486_s1, %s354_s15 }
  0x13   : > { %v221_v5 = vld [vmem:[%s191_s18] sm:$0xff] }
  0x14   : > { %v224_v6 = vsel %vm220_vm0, %v221_v5, 0.0  ;;  %v225_v8 = vld [vmem:[%s201_s21] sm:$0xff] }
  0x15   : > { %v227_v7 = vsel %vm226_vm1, %v224_v6, -inf  ;;  %v249_v16 = vsel %vm226_vm1, %v224_v6, 0.0 }
  0x16   : > { %228 = vmax.xlane.f32.xlu0 %v227_v7 }
  0x2c   : > { %242 = vperm.xlu0 %389, %v225_v8  }
  0xa3   : > { %v229_v9 = vpop.xlane.xlu0 %228 }
  0xa4   : > { %v230_v10 = vsub.f32 %v224_v6, %v229_v9 }
  0xa6   : > { %v231_v11 = vmul.f32 1.442695, %v230_v10 }
  0xa8   : > { %390 = vpow2.f32 %v231_v11 }
  0xab   : > { %v243_v13 = vpop.permute.xlu0 %242 }
  0xac   : > { %vm244_vm2 = vcmp.eq.s32.totalorder %v240_v12, %v243_v13 }
  0xad   : > { %v245_v17 = vsel %vm244_vm2, %v224_v6, 0.0 }
  0xae   : > { %v246_v18 = vsel %vm226_vm1, %v245_v17, 0.0 }
  0xb2   : > { %v391_v14 = vpop.eup %390 }
  0xb3   : > { %v233_v15 = vsel %vm226_vm1, %v391_v14, 0.0 }
  0xb4   : > { %234 = vadd.xlane.f32.xlu1 %v233_v15 }
  0xb8   : > { %250 = vadd.xlane.f32.xlu1 %v249_v16 }
  0xbc   : > { %247 = vadd.xlane.f32.xlu1 %v246_v18 }
 0x141   : > { %v235_v19 = vpop.xlane.xlu1 %234 }
 0x142   : > { %392 = vlog2.f32 %v235_v19 }
 0x145   : > { %v251_v24 = vpop.xlane.xlu1 %250 }
 0x149   : > { %v248_v26 = vpop.xlane.xlu1 %247 }
 0x14c   : > { %v393_v20 = vpop.eup %392 }
 0x14d   : > { %v237_v21 = vmul.f32 0.6931472, %v393_v20 }
 0x14f   : > { %v238_v22 = vadd.f32 %v237_v21, %v229_v9 }
 0x151   : > { %v253_v23 = vmul.f32 16.0, %v238_v22  ;;  %v252_v27 = vsub.f32 %v238_v22, %v248_v26 }
 0x153   : > { %v254_v25 = vsub.f32 %v253_v23, %v251_v24 }
 0x155   : > { %394 = vrcp.f32 %v254_v25 }
 0x15f   : > { %v395_v28 = vpop.eup %394 }
 0x160   : > { %v256_v29 = vmul.f32 %v395_v28, %v252_v27 }
 0x162   : > { %v258_v30 = vsel %vm220_vm0, %v256_v29, 0.0 }
 0x163   : > { %v260_v31 = vsel %vm259_vm3, %v258_v30, 0.0 }
 0x164   : > { %261 = vadd.xlane.f32.xlu1 %v260_v31 }
 0x1f1   : > { %v262_v32 = vpop.xlane.xlu1 %261 }
 0x1f2   : > { %v263_v33 = vrot.slane %v262_v32, 4 }
 0x1f4   : > { %v264_v34 = vadd.f32 %v263_v33, %v262_v32 }
 0x1f6   : > { %v265_v35 = vrot.slane %v264_v34, 2 }
 0x1f8   : > { %v266_v36 = vadd.f32 %v265_v35, %v264_v34 }
 0x1fa   : > { %v267_v37 = vrot.slane %v266_v36, 1 }
 0x1fc   : > { %v268_v38 = vadd.f32 %v267_v37, %v266_v36 }
 0x1fe   : > { %362 = vpush %v268_v38 }
 0x22f   : > { %s363_s25 = spop %362 }
 0x230   : > { %v277_v39 = vstv %s363_s25 }
 0x231   : > { %278 = vst [vmem:[%s207_s24] sm:$0x1] %v277_v39 }
 0x232 PF: > { %s12_s11 = sadd.s32 1, %s418_s11   ;;  %s488_s9 = smov %s414_s10 }
 0x233   : > { %p9_p6 = scmp.ge.s32.totalorder %s12_s11, 4   ;;  %s489_s10 = smov %s491_s12 }
 0x235   :  { %11 = sbr.rel (!%p9_p6) target bundleno = 2 (0x2), region = 71 }

</bundles_post_ra>
